<compile_context>
chip_gen: v5e
topology: v5e:2x2
jax: 0.10.0
libtpu: 0.0.40
codegen_flags: <defaults>
</compile_context>

<pallas_src>
import functools

import jax
import jax.numpy as jnp
from jax import lax
from jax.experimental import pallas as pl
from jax.experimental.pallas import tpu as pltpu

EPS = 1e-5
F32 = jnp.float32


@functools.lru_cache(maxsize=None)
def _vmem_limit_bytes():
    """Raise the scoped-VMEM ceiling (v5e defaults to 16 MiB) while staying
    well under the physical capacity of the current chip (v7x: 64 MiB)."""
    try:
        cap = int(pltpu.get_tpu_info().vmem_capacity_bytes)
    except Exception:
        cap = 64 << 20
    return int(min(96 << 20, (cap * 3) // 4))


# ----------------------------------------------------------------------------
# Pallas kernel: fused conv + BN(eval) [+ residual] [+ ReLU] [+ global pool]
# ----------------------------------------------------------------------------
def _conv_bn_kernel(*refs, taps_off, relu, has_residual, pool):
    """One batch element.

    refs (in order):
      x_ref     (L, C)      flattened, spatially padded image (+ tail zeros)
      w_ref     (T, C, OC)  per-tap weights, BN scale folded in
      shift_ref (1, OC)     folded conv-bias + BN shift (f32)
      res_ref   (M, OC)     optional residual (flattened, width-padded)
      mask_ref  (M, 1)      optional pooling mask (1/(oh*ow) on valid cols)
      o_ref     (M, OC) or (1, OC) output
      acc_ref   (M, OC)     f32 VMEM accumulator scratch
    """
    x_ref, w_ref, shift_ref = refs[0], refs[1], refs[2]
    i = 3
    res_ref = mask_ref = None
    if has_residual:
        res_ref = refs[i]
        i += 1
    if pool:
        mask_ref = refs[i]
        i += 1
    o_ref, acc_ref = refs[i], refs[i + 1]

    m = acc_ref.shape[0]
    # Static tap loop: one big-M MXU matmul per tap, accumulated in f32 VMEM.
    for t, off in enumerate(taps_off):
        slab = x_ref[off:off + m, :]                       # (M, C)
        contrib = jnp.dot(slab, w_ref[t],
                          preferred_element_type=jnp.float32)
        if t == 0:
            acc_ref[...] = contrib
        else:
            acc_ref[...] += contrib

    # Single fused epilogue per image block.
    out = acc_ref[...] + shift_ref[...]
    if has_residual:
        out = out + res_ref[...].astype(jnp.float32)
    if relu:
        out = jnp.maximum(out, 0.0)
    if pool:
        # Global average pool fused into the last conv (mask zeroes the
        # wrap-around padding columns and carries the 1/(oh*ow) factor).
        o_ref[...] = jnp.sum(out * mask_ref[...], axis=0,
                             keepdims=True).astype(o_ref.dtype)
    else:
        o_ref[...] = out.astype(o_ref.dtype)


# ----------------------------------------------------------------------------
# Pallas wrapper
# ----------------------------------------------------------------------------
def _conv_call(x_flat, w_k, shift, res_flat, mask, taps_off, M, OC, relu,
               pool, compute_dtype):
    """x_flat: (N, L, C), w_k: (T, C, OC), shift: (1, OC) f32."""
    N, L, C = x_flat.shape
    T = w_k.shape[0]
    has_res = res_flat is not None

    kernel = functools.partial(_conv_bn_kernel, taps_off=taps_off, relu=relu,
                               has_residual=has_res, pool=pool)

    in_specs = [
        pl.BlockSpec((None, L, C), lambda n: (n, 0, 0)),
        pl.BlockSpec((T, C, OC), lambda n: (0, 0, 0)),
        pl.BlockSpec((1, OC), lambda n: (0, 0)),
    ]
    args = [x_flat.astype(compute_dtype), w_k.astype(compute_dtype),
            shift.astype(F32)]
    if has_res:
        in_specs.append(pl.BlockSpec((None, M, OC), lambda n: (n, 0, 0)))
        args.append(res_flat.astype(compute_dtype))
    if pool:
        in_specs.append(pl.BlockSpec((M, 1), lambda n: (0, 0)))
        args.append(mask.astype(F32))

    if pool:
        out_shape = jax.ShapeDtypeStruct((N, 1, OC), F32)
        out_spec = pl.BlockSpec((None, 1, OC), lambda n: (n, 0, 0))
    else:
        out_shape = jax.ShapeDtypeStruct((N, M, OC), compute_dtype)
        out_spec = pl.BlockSpec((None, M, OC), lambda n: (n, 0, 0))

    itemsize = jnp.dtype(compute_dtype).itemsize
    flops = int(2 * N * M * T * C * OC)
    bytes_accessed = int((x_flat.size + w_k.size
                          + N * M * OC * (2 if has_res else 1)) * itemsize)

    out = pl.pallas_call(
        kernel,
        out_shape=out_shape,
        grid_spec=pltpu.PrefetchScalarGridSpec(
            num_scalar_prefetch=0,
            grid=(N,),
            in_specs=in_specs,
            out_specs=out_spec,
            scratch_shapes=[pltpu.VMEM((M, OC), jnp.float32)],
        ),
        compiler_params=pltpu.CompilerParams(
            dimension_semantics=("parallel",),
            vmem_limit_bytes=_vmem_limit_bytes()),
        cost_estimate=pl.CostEstimate(
            flops=flops, transcendentals=0, bytes_accessed=bytes_accessed),
    )(*args)

    if pool:
        return out[:, 0, :]                                # (N, OC) f32
    return out                                             # (N, M, OC)


def fused_conv_bn(x_nhwc, p, *, stride, pad, relu, residual=None, pool=False,
                  compute_dtype=jnp.bfloat16):
    """Conv2d + bias + BatchNorm(eval) [+ residual] [+ ReLU] [+ mean pool].

    NHWC in / NHWC out (or (N, OC) f32 if pool=True).
    """
    N = x_nhwc.shape[0]
    kh, kw, cin, cout = p["w"].shape

    # Fold conv bias + eval-mode BN: scale into the weights, shift into a
    # single per-channel add in the kernel epilogue.
    scale = p["gamma"] * lax.rsqrt(p["rvar"] + EPS)
    shift = (p["beta"] + (p["b"] - p["rmean"]) * scale).reshape(1, cout)
    w_eff = p["w"] * scale[None, None, None, :]

    if pad > 0:
        x_p = jnp.pad(x_nhwc, ((0, 0), (pad, pad), (pad, pad), (0, 0)))
    else:
        x_p = x_nhwc
    Hp, Wp = x_p.shape[1], x_p.shape[2]
    oh = (Hp - kh) // stride + 1
    ow = (Wp - kw) // stride + 1

    if stride == 1:
        x_eff, ke, ce = x_p, kh, cin
        w_k = w_eff.reshape(kh * kw, cin, cout)
    elif kh == 1 and kw == 1:
        # 1x1 strided shortcut: plain subsample -> 1x1 stride-1 conv.
        x_eff, ke, ce = x_p[:, ::stride, ::stride, :], 1, cin
        w_k = w_eff.reshape(1, cin, cout)
    else:
        # k x k stride-2 conv -> space-to-depth + stride-1 ceil(k/2)^2 conv.
        assert stride == 2, "ResNetBase only uses stride 1 and 2"
        He, We = Hp + Hp % 2, Wp + Wp % 2
        x_e = jnp.pad(x_p, ((0, 0), (0, He - Hp), (0, We - Wp), (0, 0)))
        Hs, Ws = He // 2, We // 2
        x_eff = x_e.reshape(N, Hs, 2, Ws, 2, cin).transpose(0, 1, 3, 2, 4, 5)
        x_eff = x_eff.reshape(N, Hs, Ws, 4 * cin)
        kq = (kh + 1) // 2
        w_pad = jnp.pad(w_eff,
                        ((0, 2 * kq - kh), (0, 2 * kq - kw), (0, 0), (0, 0)))
        w_k = w_pad.reshape(kq, 2, kq, 2, cin, cout).transpose(0, 2, 1, 3, 4, 5)
        w_k = w_k.reshape(kq * kq, 4 * cin, cout)
        ke, ce = kq, 4 * cin

    He_, We_ = x_eff.shape[1], x_eff.shape[2]
    assert He_ - ke + 1 >= oh and We_ - ke + 1 >= ow, (He_, We_, ke, oh, ow)

    # Flatten spatial dims; the kernel computes M = oh*We_ output rows per tap
    # from one contiguous slab at static offset di*We_+dj.  Row wrap-around
    # only pollutes the last ke-1 columns of each output row (discarded).
    M = oh * We_
    extra = ke - 1
    x_flat = x_eff.reshape(N, He_ * We_, ce)
    if extra > 0:
        x_flat = jnp.pad(x_flat, ((0, 0), (0, extra), (0, 0)))
    taps_off = tuple(di * We_ + dj for di in range(ke) for dj in range(ke))

    res_flat = None
    if residual is not None:
        r = residual
        if We_ > ow:
            r = jnp.pad(r, ((0, 0), (0, 0), (0, We_ - ow), (0, 0)))
        res_flat = r.reshape(N, M, cout)

    mask = None
    if pool:
        col = jnp.arange(M, dtype=jnp.int32) % We_
        mask = ((col < ow).astype(F32) / float(oh * ow)).reshape(M, 1)

    out = _conv_call(x_flat, w_k, shift, res_flat, mask, taps_off, M, cout,
                     relu, pool, compute_dtype)
    if pool:
        return out                                          # (N, cout) f32
    out = out.reshape(N, oh, We_, cout)
    return out[:, :, :ow, :]                                # strip wrap cols


# ----------------------------------------------------------------------------
# Parameter init (deterministic, synthetic) and model build
# ----------------------------------------------------------------------------
def init_conv_bn(key, kh, kw, cin, cout):
    ks = jax.random.split(key, 6)
    return {
        "w": 0.1 * jax.random.normal(ks[0], (kh, kw, cin, cout), F32),  # HWIO
        "b": 0.1 * jax.random.normal(ks[1], (cout,), F32),
        "gamma": 1.0 + 0.1 * jax.random.normal(ks[2], (cout,), F32),
        "beta": 0.1 * jax.random.normal(ks[3], (cout,), F32),
        "rmean": 0.1 * jax.random.normal(ks[4], (cout,), F32),
        "rvar": 1.0 + 0.1 * jnp.abs(jax.random.normal(ks[5], (cout,), F32)),
    }


def build_resnet_params(key, n_blocks, n_channels, bottlenecks=None,
                        img_channels=3, first_kernel_size=7):
    assert len(n_blocks) == len(n_channels)
    assert bottlenecks is None or len(bottlenecks) == len(n_channels)
    keys = iter(jax.random.split(key, 512))
    params = {
        "stem": init_conv_bn(next(keys), first_kernel_size, first_kernel_size,
                             img_channels, n_channels[0]),
        "first_kernel_size": first_kernel_size,
        "blocks": [],
    }

    def shortcut_params(cin, cout, stride):
        if stride != 1 or cin != cout:
            return init_conv_bn(next(keys), 1, 1, cin, cout)
        return None

    def make_residual(cin, cout, stride):
        return {"kind": "residual", "stride": stride,
                "conv1": init_conv_bn(next(keys), 3, 3, cin, cout),
                "conv2": init_conv_bn(next(keys), 3, 3, cout, cout),
                "shortcut": shortcut_params(cin, cout, stride)}

    def make_bottleneck(cin, mid, cout, stride):
        return {"kind": "bottleneck", "stride": stride,
                "conv1": init_conv_bn(next(keys), 1, 1, cin, mid),
                "conv2": init_conv_bn(next(keys), 3, 3, mid, mid),
                "conv3": init_conv_bn(next(keys), 1, 1, mid, cout),
                "shortcut": shortcut_params(cin, cout, stride)}

    prev = n_channels[0]
    for i, channels in enumerate(n_channels):
        stride = 2 if len(params["blocks"]) == 0 else 1
        if bottlenecks is None:
            params["blocks"].append(make_residual(prev, channels, stride))
        else:
            params["blocks"].append(
                make_bottleneck(prev, bottlenecks[i], channels, stride))
        prev = channels
        for _ in range(n_blocks[i] - 1):
            if bottlenecks is None:
                params["blocks"].append(make_residual(channels, channels, 1))
            else:
                params["blocks"].append(
                    make_bottleneck(channels, bottlenecks[i], channels, 1))
    return params


# ----------------------------------------------------------------------------
# Forward pass (Pallas), NHWC internally
# ----------------------------------------------------------------------------
def block_forward(x, blk, compute_dtype, pool=False):
    s = blk["stride"]
    if blk["shortcut"] is not None:
        sc = fused_conv_bn(x, blk["shortcut"], stride=s, pad=0, relu=False,
                           compute_dtype=compute_dtype)
    else:
        sc = x
    if blk["kind"] == "residual":
        h = fused_conv_bn(x, blk["conv1"], stride=s, pad=1, relu=True,
                          compute_dtype=compute_dtype)
        return fused_conv_bn(h, blk["conv2"], stride=1, pad=1, relu=True,
                             residual=sc, pool=pool,
                             compute_dtype=compute_dtype)
    # Bottleneck block: 1x1 -> 3x3(stride) -> 1x1, residual added after conv3.
    h = fused_conv_bn(x, blk["conv1"], stride=1, pad=0, relu=True,
                      compute_dtype=compute_dtype)
    h = fused_conv_bn(h, blk["conv2"], stride=s, pad=1, relu=True,
                      compute_dtype=compute_dtype)
    return fused_conv_bn(h, blk["conv3"], stride=1, pad=0, relu=True,
                         residual=sc, pool=pool, compute_dtype=compute_dtype)


def resnet_forward(x_nchw, params, compute_dtype=jnp.bfloat16):
    """x: (N, C, H, W) like PyTorch -> (N, n_channels[-1]) f32."""
    fk = params["first_kernel_size"]
    x = jnp.transpose(x_nchw, (0, 2, 3, 1)).astype(compute_dtype)  # NHWC once
    x = fused_conv_bn(x, params["stem"], stride=2, pad=fk // 2, relu=False,
                      compute_dtype=compute_dtype)
    n_blk = len(params["blocks"])
    for i, blk in enumerate(params["blocks"]):
        x = block_forward(x, blk, compute_dtype, pool=(i == n_blk - 1))
    return x.astype(F32)  # global mean pool fused into the last conv


# ----------------------------------------------------------------------------
# Plain-JAX reference (lax.conv, NCHW) for the correctness check
# ----------------------------------------------------------------------------
def _ref_conv_bn(x, p, stride, pad, relu, residual=None):
    w_oihw = jnp.transpose(p["w"], (3, 2, 0, 1))
    z = lax.conv_general_dilated(
        x, w_oihw, (stride, stride), [(pad, pad), (pad, pad)],
        dimension_numbers=("NCHW", "OIHW", "NCHW"))
    z = z + p["b"][None, :, None, None]
    z = (z - p["rmean"][None, :, None, None]) / jnp.sqrt(
        p["rvar"][None, :, None, None] + EPS)
    z = z * p["gamma"][None, :, None, None] + p["beta"][None, :, None, None]
    if residual is not None:
        z = z + residual
    if relu:
        z = jnp.maximum(z, 0.0)
    return z


def resnet_forward_ref(x, params):
    fk = params["first_kernel_size"]
    x = _ref_conv_bn(x, params["stem"], 2, fk // 2, False)
    for blk in params["blocks"]:
        s = blk["stride"]
        sc = x if blk["shortcut"] is None else _ref_conv_bn(
            x, blk["shortcut"], s, 0, False)
        if blk["kind"] == "residual":
            h = _ref_conv_bn(x, blk["conv1"], s, 1, True)
            x = _ref_conv_bn(h, blk["conv2"], 1, 1, True, residual=sc)
        else:
            h = _ref_conv_bn(x, blk["conv1"], 1, 0, True)
            h = _ref_conv_bn(h, blk["conv2"], s, 1, True)
            x = _ref_conv_bn(h, blk["conv3"], 1, 0, True, residual=sc)
    return x.reshape(x.shape[0], x.shape[1], -1).mean(axis=-1)


# ----------------------------------------------------------------------------
if __name__ == "__main__":
    key = jax.random.PRNGKey(0)
    k_param, k_param_bn, k_input = jax.random.split(key, 3)

    x = jax.random.normal(k_input, (2, 3, 16, 16), F32)  # NCHW, like PyTorch

    # --- ResidualBlock config (bottlenecks=None) -----------------------------
    params = build_resnet_params(k_param, n_blocks=[1, 1], n_channels=[4, 8],
                                 img_channels=3, first_kernel_size=3)
    ref = jax.block_until_ready(resnet_forward_ref(x, params))

    # f32 operands: strict check.
    out = jax.block_until_ready(resnet_forward(x, params, compute_dtype=F32))
    assert out.shape == (2, 8), out.shape
    assert jnp.allclose(out, ref, rtol=1e-3, atol=1e-3), (out, ref)

    # bf16 operands with f32 accumulation (default, MXU-friendly): loose check.
    out_bf16 = jax.block_until_ready(resnet_forward(x, params))
    assert out_bf16.shape == (2, 8), out_bf16.shape
    assert jnp.allclose(out_bf16, ref, rtol=1e-1, atol=1e-1), (out_bf16, ref)

    # --- BottleneckResidualBlock config --------------------------------------
    bparams = build_resnet_params(k_param_bn, n_blocks=[1, 1],
                                  n_channels=[4, 8], bottlenecks=[2, 4],
                                  img_channels=3, first_kernel_size=3)
    bref = jax.block_until_ready(resnet_forward_ref(x, bparams))
    bout = jax.block_until_ready(resnet_forward(x, bparams, compute_dtype=F32))
    assert bout.shape == (2, 8), bout.shape
    assert jnp.allclose(bout, bref, rtol=1e-3, atol=1e-3), (bout, bref)

    print("KERNEL_OK")
</pallas_src>

<mosaic_0001>
module attributes {stable_mosaic.version = 11 : i64} {
  func.func @_conv_bn_kernel(%arg0: i32, %arg1: memref<1x82x12xf32, #tpu.memory_space<vmem>>, %arg2: memref<4x12x4xf32, #tpu.memory_space<vmem>>, %arg3: memref<1x4xf32, #tpu.memory_space<vmem>>, %arg4: memref<1x72x4xf32, #tpu.memory_space<vmem>>, %arg5: memref<72x4xf32, #tpu.memory_space<vmem>>) attributes {dimension_semantics = [#tpu.dimension_semantics<parallel>], iteration_bounds = array<i64: 2>, scalar_prefetch = 0 : i64, scratch_operands = 1 : i64, tpu.core_type = #tpu.core_type<tc>, window_params = [{transform_indices = @transform_0, window_bounds = array<i64: 1, 82, 12>}, {pipeline_mode = #tpu.pipeline_mode<synchronous>, transform_indices = @transform_1, window_bounds = array<i64: 4, 12, 4>}, {pipeline_mode = #tpu.pipeline_mode<synchronous>, transform_indices = @transform_2, window_bounds = array<i64: 1, 4>}, {transform_indices = @transform_3, window_bounds = array<i64: 1, 72, 4>}]} {
    %c0 = arith.constant 0 : index
    %c0_0 = arith.constant 0 : index
    %c0_1 = arith.constant 0 : index
    %0 = vector.load %arg1[%c0, %c0_0, %c0_1] : memref<1x82x12xf32, #tpu.memory_space<vmem>>, vector<1x72x12xf32>
    %1 = vector.shape_cast %0 : vector<1x72x12xf32> to vector<72x12xf32>
    %c0_2 = arith.constant 0 : index
    %c0_3 = arith.constant 0 : index
    %c0_4 = arith.constant 0 : index
    %2 = vector.load %arg2[%c0_2, %c0_3, %c0_4] : memref<4x12x4xf32, #tpu.memory_space<vmem>>, vector<1x12x4xf32>
    %3 = vector.shape_cast %2 : vector<1x12x4xf32> to vector<12x4xf32>
    %cst = arith.constant dense<0.000000e+00> : vector<72x4xf32>
    %4 = tpu.matmul %1, %3, %cst {dimension_numbers = #tpu.dot_dimension_numbers<[1], [0], [0], [1], [0, 0, 1, 1], [], []>} : vector<72x12xf32>, vector<12x4xf32>, vector<72x4xf32> -> vector<72x4xf32>
    %c0_5 = arith.constant 0 : index
    %c0_6 = arith.constant 0 : index
    %5 = vector.load %arg5[%c0_5, %c0_6] : memref<72x4xf32, #tpu.memory_space<vmem>>, vector<72x4xf32>
    tpu.vector_store %arg5[%c0_5, %c0_6], %4 {strides = array<i32>} : memref<72x4xf32, #tpu.memory_space<vmem>>, vector<72x4xf32>,
    %c0_7 = arith.constant 0 : index
    %c1 = arith.constant 1 : index
    %c0_8 = arith.constant 0 : index
    %6 = vector.load %arg1[%c0_7, %c1, %c0_8] : memref<1x82x12xf32, #tpu.memory_space<vmem>>, vector<1x72x12xf32>
    %7 = vector.shape_cast %6 : vector<1x72x12xf32> to vector<72x12xf32>
    %c1_9 = arith.constant 1 : index
    %c0_10 = arith.constant 0 : index
    %c0_11 = arith.constant 0 : index
    %8 = vector.load %arg2[%c1_9, %c0_10, %c0_11] : memref<4x12x4xf32, #tpu.memory_space<vmem>>, vector<1x12x4xf32>
    %9 = vector.shape_cast %8 : vector<1x12x4xf32> to vector<12x4xf32>
    %cst_12 = arith.constant dense<0.000000e+00> : vector<72x4xf32>
    %10 = tpu.matmul %7, %9, %cst_12 {dimension_numbers = #tpu.dot_dimension_numbers<[1], [0], [0], [1], [0, 0, 1, 1], [], []>} : vector<72x12xf32>, vector<12x4xf32>, vector<72x4xf32> -> vector<72x4xf32>
    %c0_13 = arith.constant 0 : index
    %c0_14 = arith.constant 0 : index
    %11 = vector.load %arg5[%c0_13, %c0_14] : memref<72x4xf32, #tpu.memory_space<vmem>>, vector<72x4xf32>
    %12 = arith.addf %11, %10 : vector<72x4xf32>
    %c0_15 = arith.constant 0 : index
    %c0_16 = arith.constant 0 : index
    %13 = vector.load %arg5[%c0_15, %c0_16] : memref<72x4xf32, #tpu.memory_space<vmem>>, vector<72x4xf32>
    tpu.vector_store %arg5[%c0_15, %c0_16], %12 {strides = array<i32>} : memref<72x4xf32, #tpu.memory_space<vmem>>, vector<72x4xf32>,
    %c0_17 = arith.constant 0 : index
    %c9 = arith.constant 9 : index
    %c0_18 = arith.constant 0 : index
    %14 = vector.load %arg1[%c0_17, %c9, %c0_18] : memref<1x82x12xf32, #tpu.memory_space<vmem>>, vector<1x72x12xf32>
    %15 = vector.shape_cast %14 : vector<1x72x12xf32> to vector<72x12xf32>
    %c2 = arith.constant 2 : index
    %c0_19 = arith.constant 0 : index
    %c0_20 = arith.constant 0 : index
    %16 = vector.load %arg2[%c2, %c0_19, %c0_20] : memref<4x12x4xf32, #tpu.memory_space<vmem>>, vector<1x12x4xf32>
    %17 = vector.shape_cast %16 : vector<1x12x4xf32> to vector<12x4xf32>
    %cst_21 = arith.constant dense<0.000000e+00> : vector<72x4xf32>
    %18 = tpu.matmul %15, %17, %cst_21 {dimension_numbers = #tpu.dot_dimension_numbers<[1], [0], [0], [1], [0, 0, 1, 1], [], []>} : vector<72x12xf32>, vector<12x4xf32>, vector<72x4xf32> -> vector<72x4xf32>
    %c0_22 = arith.constant 0 : index
    %c0_23 = arith.constant 0 : index
    %19 = vector.load %arg5[%c0_22, %c0_23] : memref<72x4xf32, #tpu.memory_space<vmem>>, vector<72x4xf32>
    %20 = arith.addf %19, %18 : vector<72x4xf32>
    %c0_24 = arith.constant 0 : index
    %c0_25 = arith.constant 0 : index
    %21 = vector.load %arg5[%c0_24, %c0_25] : memref<72x4xf32, #tpu.memory_space<vmem>>, vector<72x4xf32>
    tpu.vector_store %arg5[%c0_24, %c0_25], %20 {strides = array<i32>} : memref<72x4xf32, #tpu.memory_space<vmem>>, vector<72x4xf32>,
    %c0_26 = arith.constant 0 : index
    %c10 = arith.constant 10 : index
    %c0_27 = arith.constant 0 : index
    %22 = vector.load %arg1[%c0_26, %c10, %c0_27] : memref<1x82x12xf32, #tpu.memory_space<vmem>>, vector<1x72x12xf32>
    %23 = vector.shape_cast %22 : vector<1x72x12xf32> to vector<72x12xf32>
    %c3 = arith.constant 3 : index
    %c0_28 = arith.constant 0 : index
    %c0_29 = arith.constant 0 : index
    %24 = vector.load %arg2[%c3, %c0_28, %c0_29] : memref<4x12x4xf32, #tpu.memory_space<vmem>>, vector<1x12x4xf32>
    %25 = vector.shape_cast %24 : vector<1x12x4xf32> to vector<12x4xf32>
    %cst_30 = arith.constant dense<0.000000e+00> : vector<72x4xf32>
    %26 = tpu.matmul %23, %25, %cst_30 {dimension_numbers = #tpu.dot_dimension_numbers<[1], [0], [0], [1], [0, 0, 1, 1], [], []>} : vector<72x12xf32>, vector<12x4xf32>, vector<72x4xf32> -> vector<72x4xf32>
    %c0_31 = arith.constant 0 : index
    %c0_32 = arith.constant 0 : index
    %27 = vector.load %arg5[%c0_31, %c0_32] : memref<72x4xf32, #tpu.memory_space<vmem>>, vector<72x4xf32>
    %28 = arith.addf %27, %26 : vector<72x4xf32>
    %c0_33 = arith.constant 0 : index
    %c0_34 = arith.constant 0 : index
    %29 = vector.load %arg5[%c0_33, %c0_34] : memref<72x4xf32, #tpu.memory_space<vmem>>, vector<72x4xf32>
    tpu.vector_store %arg5[%c0_33, %c0_34], %28 {strides = array<i32>} : memref<72x4xf32, #tpu.memory_space<vmem>>, vector<72x4xf32>,
    %c0_35 = arith.constant 0 : index
    %c0_36 = arith.constant 0 : index
    %30 = vector.load %arg5[%c0_35, %c0_36] : memref<72x4xf32, #tpu.memory_space<vmem>>, vector<72x4xf32>
    %c0_37 = arith.constant 0 : index
    %c0_38 = arith.constant 0 : index
    %31 = vector.load %arg3[%c0_37, %c0_38] : memref<1x4xf32, #tpu.memory_space<vmem>>, vector<1x4xf32>
    %32 = vector.broadcast %31 : vector<1x4xf32> to vector<72x4xf32>
    %33 = arith.addf %30, %32 : vector<72x4xf32>
    %c0_39 = arith.constant 0 : index
    %c0_40 = arith.constant 0 : index
    %c0_41 = arith.constant 0 : index
    %34 = vector.load %arg4[%c0_39, %c0_40, %c0_41] : memref<1x72x4xf32, #tpu.memory_space<vmem>>, vector<1x72x4xf32>
    %35 = vector.shape_cast %34 : vector<1x72x4xf32> to vector<72x4xf32>
    %36 = vector.shape_cast %33 : vector<72x4xf32> to vector<1x72x4xf32>
    tpu.vector_store %arg4[%c0_39, %c0_40, %c0_41], %36 {strides = array<i32>} : memref<1x72x4xf32, #tpu.memory_space<vmem>>, vector<1x72x4xf32>,
    return
  }
  func.func @transform_0(%arg0: i32) -> (i32, i32, i32) {
    %c0_i32 = arith.constant 0 : i32
    %c0_i32_0 = arith.constant 0 : i32
    %c0_i32_1 = arith.constant 0 : i32
    return %arg0, %c0_i32, %c0_i32_0 : i32, i32, i32
  }
  func.func @transform_1(%arg0: i32) -> (i32, i32, i32) {
    %c0_i32 = arith.constant 0 : i32
    %c0_i32_0 = arith.constant 0 : i32
    %c0_i32_1 = arith.constant 0 : i32
    %c0_i32_2 = arith.constant 0 : i32
    return %c0_i32, %c0_i32_0, %c0_i32_1 : i32, i32, i32
  }
  func.func @transform_2(%arg0: i32) -> (i32, i32) {
    %c0_i32 = arith.constant 0 : i32
    %c0_i32_0 = arith.constant 0 : i32
    %c0_i32_1 = arith.constant 0 : i32
    return %c0_i32, %c0_i32_0 : i32, i32
  }
  func.func @transform_3(%arg0: i32) -> (i32, i32, i32) {
    %c0_i32 = arith.constant 0 : i32
    %c0_i32_0 = arith.constant 0 : i32
    %c0_i32_1 = arith.constant 0 : i32
    return %arg0, %c0_i32, %c0_i32_0 : i32, i32, i32
  }
}

</mosaic_0001>

<bundles_post_ra>
// kernel: tpu_custom_call.1
= control target key start
LH: loop header
LB: loop body
LE: loop exit
PB: predicated region body
PF: predicated region fallthrough
CT: control target
= control target key end

     0   :  { %s787_s12 = smov 0   ;;  %s968_s0 = inlined_call_operand.vmem [shape: f32[2,82,12], index: 0, kind: input, shape index: {}]   ;;  %s969_s1 = inlined_call_operand.vmem [shape: f32[4,12,4], index: 1, kind: input, shape index: {}]   ;;  %s970_s2 = inlined_call_operand.vmem [shape: f32[1,4], index: 2, kind: input, shape index: {}]   ;;  %s971_s3 = inlined_call_operand.vmem [shape: f32[2,72,4], index: 3, kind: output, shape index: {}]  }
   0x1 LB: > { %s693_s13 = sadd.s32 4294967295, %s765_s12   ;;  %p697_p0 = scmp.ge.s32.totalorder %s765_s12, 1  ;;  %s765_s12 = sphi %s787_s12, %s13_s12  }
   0x2   : > { %p137_p1 = scmp.lt.s32.totalorder %s765_s12, 3 }
   0x4   : > { %p138_p2 = pnand %p697_p0, %p137_p1 }
   0x5   : > { %p161_p3 = scmp.lt.s32.totalorder (!%p138_p2), %s693_s13, 1 }
   0x6   : > { %141 = sbr.rel (%p138_p2) target bundleno = 249 (0xf9), region = 32 }
   0xb   : > { %v181_v0 = vld [vmem:[%s969_s1 + $0x8] sm:$0xf]  ;;  %vm210_vm0 = vcmask 1043456   ;;  %v180_v1 = vld [vmem:[%s969_s1] sm:$0xff]  ;;  %v711_v2 = vld [vmem:[%s969_s1 + $0x18] sm:$0xf] }
   0xc   : > { %700 = vmatpush.msk.msra.mxu0 %vm210_vm0, %v181_v0  ;;  %v710_v3 = vld [vmem:[%s969_s1 + $0x10] sm:$0xff]  ;;  %v723_v4 = vld [vmem:[%s969_s1 + $0x28] sm:$0xf]  ;;  %s973_s13 = smov (!%p161_p3, %s693_s13), 1  ;;  %712 = vmatpush.msk.msra.mxu1 %vm210_vm0, %v711_v2  ;;  %v722_v5 = vld [vmem:[%s969_s1 + $0x20] sm:$0xff]  ;;  %vm182_vm1 = vcmask 97280  }
   0xd   : > { %724 = vmatpush.msk.msra.mxu2 %vm210_vm0, %v723_v4  ;;  %v735_v6 = vld [vmem:[%s969_s1 + $0x38] sm:$0xf]  ;;  %v734_v7 = vld [vmem:[%s969_s1 + $0x30] sm:$0xff]  ;;  %s748_s30 = smul.u32 88, %s973_s13  ;;  %vm258_vm2 = vcmask 31744  }
   0xe   : > { %229 = vmatpush.msra.mxu0 %v180_v1  ;;  %736 = vmatpush.msk.msra.mxu3 %vm210_vm0, %v735_v6  ;;  %s749_s7 = smul.u32 72, %s973_s13  ;;  %v906_v4 = vld [vmem:[%s970_s2] ss:$0 sm:$0xff] }
   0xf   : > { %325 = vmatpush.msra.mxu1 %v710_v3  ;;  %438 = vmatpush.msra.mxu2 %v722_v5  ;;  %s825_s6 = scalar_lea.vmem %s968_s0, %s748_s30 }
  0x10   : > { %551 = vmatpush.msra.mxu3 %v734_v7  ;;  %v171_v8 = vld [vmem:[%s825_s6] sm:$0xff]  ;;  %v381_v10 = vld [vmem:[%s825_s6 + $0x9] sm:$0xff]  ;;  %v382_v13 = vld [vmem:[%s825_s6 + $0x11] sm:$0xff]  ;;  %s913_s14 = scalar_lea.vmem %s971_s3, %s749_s7 }
  0x11   : > { %v268_v9 = vld [vmem:[%s825_s6 + $0x1] sm:$0xff]  ;;  %701 = vmatmul.msk.f32.vlgmr.msra.gmra.mxu0 %vm182_vm1, %v171_v8  ;;  %725 = vmatmul.msk.f32.vlgmr.msra.gmra.mxu2 %vm182_vm1, %v381_v10  ;;  %v494_v11 = vld [vmem:[%s825_s6 + $0xa] sm:$0xff]  ;;  %v495_v14 = vld [vmem:[%s825_s6 + $0x12] sm:$0xff] }
  0x12   : > { %713 = vmatmul.msk.f32.vlgmr.msra.gmra.mxu1 %vm182_vm1, %v268_v9  ;;  %737 = vmatmul.msk.f32.vlgmr.msra.gmra.mxu3 %vm182_vm1, %v494_v11  ;;  %v172_v12 = vld [vmem:[%s825_s6 + $0x8] sm:$0xff]  ;;  %v173_v15 = vld [vmem:[%s825_s6 + $0x10] sm:$0xff]  ;;  %v383_v16 = vld [vmem:[%s825_s6 + $0x19] sm:$0xff] }
  0x13   : > { %v496_v17 = vld [vmem:[%s825_s6 + $0x1a] sm:$0xff]  ;;  %v497_v20 = vld [vmem:[%s825_s6 + $0x22] sm:$0xff]  ;;  %v498_v23 = vld [vmem:[%s825_s6 + $0x2a] sm:$0xff] }
  0x14   : > { %v174_v18 = vld [vmem:[%s825_s6 + $0x18] sm:$0xff]  ;;  %v384_v19 = vld [vmem:[%s825_s6 + $0x21] sm:$0xff]  ;;  %v385_v22 = vld [vmem:[%s825_s6 + $0x29] sm:$0xff] }
  0x15   : > { %v175_v21 = vld [vmem:[%s825_s6 + $0x20] sm:$0xff]  ;;  %v176_v24 = vld [vmem:[%s825_s6 + $0x28] sm:$0xff]  ;;  %v386_v25 = vld [vmem:[%s825_s6 + $0x31] sm:$0xff] }
  0x16   : > { %v499_v26 = vld [vmem:[%s825_s6 + $0x32] sm:$0xff]  ;;  %v500_v29 = vld [vmem:[%s825_s6 + $0x3a] sm:$0xff]  ;;  %v501_v32 = vld [vmem:[%s825_s6 + $0x42] sm:$0xff] }
  0x17   : > { %v177_v27 = vld [vmem:[%s825_s6 + $0x30] sm:$0xff]  ;;  %v387_v28 = vld [vmem:[%s825_s6 + $0x39] sm:$0xff]  ;;  %v388_v31 = vld [vmem:[%s825_s6 + $0x41] sm:$0xff] }
  0x18   : > { %v178_v30 = vld [vmem:[%s825_s6 + $0x38] sm:$0xff]  ;;  %v179_v33 = vld [vmem:[%s825_s6 + $0x40] sm:$0xff]  ;;  %v389_v34 = vld [vmem:[%s825_s6 + $0x49] sm:$0xff] }
  0x19   : > { %702 = vmatmul.msk.f32.gmra.mxu0 %vm182_vm1, %v172_v12  ;;  %726 = vmatmul.msk.f32.gmra.mxu2 %vm182_vm1, %v382_v13  ;;  %v502_v35 = vld [vmem:[%s825_s6 + $0x4a] sm:$0xff] }
  0x1a   : > { %714 = vmatmul.msk.f32.gmra.mxu1 %vm182_vm1, %v381_v10  ;;  %738 = vmatmul.msk.f32.gmra.mxu3 %vm182_vm1, %v495_v14 }
  0x21   : > { %703 = vmatmul.msk.f32.gmra.mxu0 %vm182_vm1, %v173_v15  ;;  %727 = vmatmul.msk.f32.gmra.mxu2 %vm182_vm1, %v383_v16 }
  0x22   : > { %715 = vmatmul.msk.f32.gmra.mxu1 %vm182_vm1, %v382_v13  ;;  %739 = vmatmul.msk.f32.gmra.mxu3 %vm182_vm1, %v496_v17 }
  0x29   : > { %704 = vmatmul.msk.f32.gmra.mxu0 %vm182_vm1, %v174_v18  ;;  %728 = vmatmul.msk.f32.gmra.mxu2 %vm182_vm1, %v384_v19 }
  0x2a   : > { %716 = vmatmul.msk.f32.gmra.mxu1 %vm182_vm1, %v383_v16  ;;  %740 = vmatmul.msk.f32.gmra.mxu3 %vm182_vm1, %v497_v20 }
  0x31   : > { %705 = vmatmul.msk.f32.gmra.mxu0 %vm182_vm1, %v175_v21  ;;  %729 = vmatmul.msk.f32.gmra.mxu2 %vm182_vm1, %v385_v22 }
  0x32   : > { %717 = vmatmul.msk.f32.gmra.mxu1 %vm182_vm1, %v384_v19  ;;  %741 = vmatmul.msk.f32.gmra.mxu3 %vm182_vm1, %v498_v23 }
  0x39   : > { %706 = vmatmul.msk.f32.gmra.mxu0 %vm182_vm1, %v176_v24  ;;  %730 = vmatmul.msk.f32.gmra.mxu2 %vm182_vm1, %v386_v25 }
  0x3a   : > { %718 = vmatmul.msk.f32.gmra.mxu1 %vm182_vm1, %v385_v22  ;;  %742 = vmatmul.msk.f32.gmra.mxu3 %vm182_vm1, %v499_v26 }
  0x41   : > { %707 = vmatmul.msk.f32.gmra.mxu0 %vm182_vm1, %v177_v27  ;;  %731 = vmatmul.msk.f32.gmra.mxu2 %vm182_vm1, %v387_v28 }
  0x42   : > { %719 = vmatmul.msk.f32.gmra.mxu1 %vm182_vm1, %v386_v25  ;;  %743 = vmatmul.msk.f32.gmra.mxu3 %vm182_vm1, %v500_v29 }
  0x49   : > { %708 = vmatmul.msk.f32.gmra.mxu0 %vm182_vm1, %v178_v30  ;;  %732 = vmatmul.msk.f32.gmra.mxu2 %vm182_vm1, %v388_v31 }
  0x4a   : > { %720 = vmatmul.msk.f32.gmra.mxu1 %vm182_vm1, %v387_v28  ;;  %744 = vmatmul.msk.f32.gmra.mxu3 %vm182_vm1, %v501_v32 }
  0x51   : > { %709 = vmatmul.msk.f32.gmra.mxu0 %vm182_vm1, %v179_v33  ;;  %733 = vmatmul.msk.f32.gmra.mxu2 %vm182_vm1, %v389_v34 }
  0x52   : > { %721 = vmatmul.msk.f32.gmra.mxu1 %vm182_vm1, %v388_v31  ;;  %745 = vmatmul.msk.f32.gmra.mxu3 %vm182_vm1, %v502_v35 }
  0x8e   : > { %v231_v36 = vpop.f32.mrf.mxu0 }
  0x8f   : > { %v327_v37 = vpop.f32.mrf.mxu1  ;;  %259 = vst.msk [vmem:[#allocation2] sm:$0xff] %vm258_vm2, %v231_v36 }
  0x94   : > { %v440_v38 = vpop.f32.mrf.mxu2 }
  0x95   : > { %v553_v43 = vpop.f32.mrf.mxu3 }
  0x96   : > { %v234_v39 = vpop.f32.mrf.mxu0  ;;  %v354_v40 = vld [vmem:[#allocation2] sm:$0xff] }
  0x97   : > { %v330_v41 = vpop.f32.mrf.mxu1  ;;  %260 = vst.msk [vmem:[#allocation2 + $0x8] sm:$0xff] %vm258_vm2, %v234_v39  ;;  %v363_v42 = vadd.f32 %v354_v40, %v327_v37 }
  0x99   : > { %372 = vst.msk [vmem:[#allocation2] sm:$0xff] %vm258_vm2, %v363_v42 }
  0x9c   : > { %v443_v44 = vpop.f32.mrf.mxu2 }
  0x9d   : > { %v556_v51 = vpop.f32.mrf.mxu3 }
  0x9e   : > { %v237_v45 = vpop.f32.mrf.mxu0  ;;  %v355_v46 = vld [vmem:[#allocation2 + $0x8] sm:$0xff] }
  0x9f   : > { %v333_v47 = vpop.f32.mrf.mxu1  ;;  %261 = vst.msk [vmem:[#allocation2 + $0x10] sm:$0xff] %vm258_vm2, %v237_v45  ;;  %v364_v48 = vadd.f32 %v355_v46, %v330_v41 }
  0xa0   : > { %v467_v49 = vld [vmem:[#allocation2] sm:$0xff] }
  0xa1   : > { %373 = vst.msk [vmem:[#allocation2 + $0x8] sm:$0xff] %vm258_vm2, %v364_v48  ;;  %v476_v50 = vadd.f32 %v467_v49, %v440_v38 }
  0xa3   : > { %485 = vst.msk [vmem:[#allocation2] sm:$0xff] %vm258_vm2, %v476_v50 }
  0xa4   : > { %v446_v52 = vpop.f32.mrf.mxu2 }
  0xa5   : > { %v559_v61 = vpop.f32.mrf.mxu3 }
  0xa6   : > { %v240_v53 = vpop.f32.mrf.mxu0  ;;  %v356_v54 = vld [vmem:[#allocation2 + $0x10] sm:$0xff] }
  0xa7   : > { %v336_v55 = vpop.f32.mrf.mxu1  ;;  %262 = vst.msk [vmem:[#allocation2 + $0x18] sm:$0xff] %vm258_vm2, %v240_v53  ;;  %v365_v56 = vadd.f32 %v356_v54, %v333_v47 }
  0xa8   : > { %v468_v57 = vld [vmem:[#allocation2 + $0x8] sm:$0xff] }
  0xa9   : > { %374 = vst.msk [vmem:[#allocation2 + $0x10] sm:$0xff] %vm258_vm2, %v365_v56  ;;  %v477_v58 = vadd.f32 %v468_v57, %v443_v44 }
  0xaa   : > { %v580_v59 = vld [vmem:[#allocation2] sm:$0xff] }
  0xab   : > { %486 = vst.msk [vmem:[#allocation2 + $0x8] sm:$0xff] %vm258_vm2, %v477_v58  ;;  %v589_v60 = vadd.f32 %v580_v59, %v553_v43 }
  0xac   : > { %v449_v62 = vpop.f32.mrf.mxu2 }
  0xad   : > { %598 = vst.msk [vmem:[#allocation2] sm:$0xff] %vm258_vm2, %v589_v60  ;;  %v562_v12 = vpop.f32.mrf.mxu3 }
  0xae   : > { %v243_v63 = vpop.f32.mrf.mxu0  ;;  %v357_v0 = vld [vmem:[#allocation2 + $0x18] sm:$0xff] }
  0xaf   : > { %v339_v1 = vpop.f32.mrf.mxu1  ;;  %263 = vst.msk [vmem:[#allocation2 + $0x20] sm:$0xff] %vm258_vm2, %v243_v63  ;;  %v366_v2 = vadd.f32 %v357_v0, %v336_v55 }
  0xb0   : > { %v469_v3 = vld [vmem:[#allocation2 + $0x10] sm:$0xff] }
  0xb1   : > { %375 = vst.msk [vmem:[#allocation2 + $0x18] sm:$0xff] %vm258_vm2, %v366_v2  ;;  %v478_v5 = vadd.f32 %v469_v3, %v446_v52 }
  0xb2   : > { %v581_v6 = vld [vmem:[#allocation2 + $0x8] sm:$0xff] }
  0xb3   : > { %487 = vst.msk [vmem:[#allocation2 + $0x10] sm:$0xff] %vm258_vm2, %v478_v5  ;;  %v590_v7 = vadd.f32 %v581_v6, %v556_v51 }
  0xb4   : > { %v607_v8 = vld [vmem:[#allocation2] sm:$0xff]  ;;  %v452_v15 = vpop.f32.mrf.mxu2 }
  0xb5   : > { %v620_v9 = vadd.f32 %v906_v4, %v607_v8  ;;  %599 = vst.msk [vmem:[#allocation2 + $0x8] sm:$0xff] %vm258_vm2, %v590_v7  ;;  %v565_v26 = vpop.f32.mrf.mxu3 }
  0xb6   : > { %v246_v10 = vpop.f32.mrf.mxu0  ;;  %v358_v11 = vld [vmem:[#allocation2 + $0x20] sm:$0xff] }
  0xb7   : > { %629 = vst.msk [vmem:[%s913_s14] sm:$0xff] %vm258_vm2, %v620_v9  ;;  %v367_v13 = vadd.f32 %v358_v11, %v339_v1  ;;  %v342_v14 = vpop.f32.mrf.mxu1 }
  0xb8   : > { %264 = vst.msk [vmem:[#allocation2 + $0x28] sm:$0xff] %vm258_vm2, %v246_v10  ;;  %v470_v16 = vld [vmem:[#allocation2 + $0x18] sm:$0xff] }
  0xb9   : > { %376 = vst.msk [vmem:[#allocation2 + $0x20] sm:$0xff] %vm258_vm2, %v367_v13  ;;  %v479_v17 = vadd.f32 %v470_v16, %v449_v62 }
  0xba   : > { %v582_v18 = vld [vmem:[#allocation2 + $0x10] sm:$0xff] }
  0xbb   : > { %488 = vst.msk [vmem:[#allocation2 + $0x18] sm:$0xff] %vm258_vm2, %v479_v17  ;;  %v591_v19 = vadd.f32 %v582_v18, %v559_v61 }
  0xbc   : > { %v608_v20 = vld [vmem:[#allocation2 + $0x8] sm:$0xff]  ;;  %v455_v29 = vpop.f32.mrf.mxu2 }
  0xbd   : > { %v621_v21 = vadd.f32 %v906_v4, %v608_v20  ;;  %600 = vst.msk [vmem:[#allocation2 + $0x10] sm:$0xff] %vm258_vm2, %v591_v19  ;;  %v568_v40 = vpop.f32.mrf.mxu3 }
  0xbe   : > { %v249_v22 = vpop.f32.mrf.mxu0 }
  0xbf   : > { %630 = vst.msk [vmem:[%s913_s14 + $0x8] sm:$0xff] %vm258_vm2, %v621_v21  ;;  %v359_v23 = vld [vmem:[#allocation2 + $0x28] sm:$0xff]  ;;  %v345_v28 = vpop.f32.mrf.mxu1 }
  0xc0   : > { %265 = vst.msk [vmem:[#allocation2 + $0x30] sm:$0xff] %vm258_vm2, %v249_v22  ;;  %v368_v24 = vadd.f32 %v359_v23, %v342_v14  ;;  %v471_v25 = vld [vmem:[#allocation2 + $0x20] sm:$0xff] }
  0xc1   : > { %v480_v27 = vadd.f32 %v471_v25, %v452_v15 }
  0xc2   : > { %377 = vst.msk [vmem:[#allocation2 + $0x28] sm:$0xff] %vm258_vm2, %v368_v24  ;;  %v583_v30 = vld [vmem:[#allocation2 + $0x18] sm:$0xff] }
  0xc3   : > { %489 = vst.msk [vmem:[#allocation2 + $0x20] sm:$0xff] %vm258_vm2, %v480_v27  ;;  %v592_v31 = vadd.f32 %v583_v30, %v562_v12 }
  0xc4   : > { %v609_v32 = vld [vmem:[#allocation2 + $0x10] sm:$0xff]  ;;  %v458_v43 = vpop.f32.mrf.mxu2 }
  0xc5   : > { %v622_v33 = vadd.f32 %v906_v4, %v609_v32  ;;  %601 = vst.msk [vmem:[#allocation2 + $0x18] sm:$0xff] %vm258_vm2, %v592_v31  ;;  %v571_v54 = vpop.f32.mrf.mxu3 }
  0xc6   : > { %v252_v34 = vpop.f32.mrf.mxu0 }
  0xc7   : > { %631 = vst.msk [vmem:[%s913_s14 + $0x10] sm:$0xff] %vm258_vm2, %v622_v33  ;;  %v360_v35 = vld [vmem:[#allocation2 + $0x30] sm:$0xff]  ;;  %v348_v42 = vpop.f32.mrf.mxu1 }
  0xc8   : > { %266 = vst.msk [vmem:[#allocation2 + $0x38] sm:$0xff] %vm258_vm2, %v252_v34  ;;  %v369_v36 = vadd.f32 %v360_v35, %v345_v28 }
  0xc9   : > { %v472_v37 = vld [vmem:[#allocation2 + $0x28] sm:$0xff] }
  0xca   : > { %378 = vst.msk [vmem:[#allocation2 + $0x30] sm:$0xff] %vm258_vm2, %v369_v36  ;;  %v481_v38 = vadd.f32 %v472_v37, %v455_v29  ;;  %v584_v39 = vld [vmem:[#allocation2 + $0x20] sm:$0xff] }
  0xcb   : > { %v593_v41 = vadd.f32 %v584_v39, %v565_v26 }
  0xcc   : > { %v610_v44 = vld [vmem:[#allocation2 + $0x18] sm:$0xff]  ;;  %490 = vst.msk [vmem:[#allocation2 + $0x28] sm:$0xff] %vm258_vm2, %v481_v38  ;;  %v461_v57 = vpop.f32.mrf.mxu2 }
  0xcd   : > { %v623_v45 = vadd.f32 %v906_v4, %v610_v44  ;;  %602 = vst.msk [vmem:[#allocation2 + $0x20] sm:$0xff] %vm258_vm2, %v593_v41  ;;  %v574_v3 = vpop.f32.mrf.mxu3 }
  0xce   : > { %v255_v46 = vpop.f32.mrf.mxu0 }
  0xcf   : > { %632 = vst.msk [vmem:[%s913_s14 + $0x18] sm:$0xff] %vm258_vm2, %v623_v45  ;;  %v361_v47 = vld [vmem:[#allocation2 + $0x38] sm:$0xff]  ;;  %v351_v56 = vpop.f32.mrf.mxu1 }
  0xd0   : > { %267 = vst.msk [vmem:[#allocation2 + $0x40] sm:$0xff] %vm258_vm2, %v255_v46  ;;  %v370_v48 = vadd.f32 %v361_v47, %v348_v42 }
  0xd1   : > { %v473_v49 = vld [vmem:[#allocation2 + $0x30] sm:$0xff] }
  0xd2   : > { %379 = vst.msk [vmem:[#allocation2 + $0x38] sm:$0xff] %vm258_vm2, %v370_v48  ;;  %v482_v50 = vadd.f32 %v473_v49, %v458_v43 }
  0xd3   : > { %v585_v51 = vld [vmem:[#allocation2 + $0x28] sm:$0xff] }
  0xd4   : > { %v611_v52 = vld [vmem:[#allocation2 + $0x20] sm:$0xff]  ;;  %491 = vst.msk [vmem:[#allocation2 + $0x30] sm:$0xff] %vm258_vm2, %v482_v50  ;;  %v594_v53 = vadd.f32 %v585_v51, %v568_v40  ;;  %v464_v2 = vpop.f32.mrf.mxu2 }
  0xd5   : > { %v624_v55 = vadd.f32 %v906_v4, %v611_v52  ;;  %v577_v11 = vpop.f32.mrf.mxu3 }
  0xd6   : > { %603 = vst.msk [vmem:[#allocation2 + $0x28] sm:$0xff] %vm258_vm2, %v594_v53 }
  0xd7   : > { %633 = vst.msk [vmem:[%s913_s14 + $0x20] sm:$0xff] %vm258_vm2, %v624_v55  ;;  %v362_v58 = vld [vmem:[#allocation2 + $0x40] sm:$0xff] }
  0xd8   : > { %v371_v59 = vadd.f32 %v362_v58, %v351_v56 }
  0xd9   : > { %v474_v60 = vld [vmem:[#allocation2 + $0x38] sm:$0xff] }
  0xda   : > { %380 = vst.msk [vmem:[#allocation2 + $0x40] sm:$0xff] %vm258_vm2, %v371_v59  ;;  %v483_v61 = vadd.f32 %v474_v60, %v461_v57 }
  0xdb   : > { %v586_v62 = vld [vmem:[#allocation2 + $0x30] sm:$0xff] }
  0xdc   : > { %492 = vst.msk [vmem:[#allocation2 + $0x38] sm:$0xff] %vm258_vm2, %v483_v61  ;;  %v595_v63 = vadd.f32 %v586_v62, %v571_v54 }
  0xdd   : > { %v612_v0 = vld [vmem:[#allocation2 + $0x28] sm:$0xff] }
  0xde   : > { %v625_v1 = vadd.f32 %v906_v4, %v612_v0  ;;  %604 = vst.msk [vmem:[#allocation2 + $0x30] sm:$0xff] %vm258_vm2, %v595_v63 }
  0xe0   : > { %634 = vst.msk [vmem:[%s913_s14 + $0x28] sm:$0xff] %vm258_vm2, %v625_v1 }
  0xe1   : > { %v475_v5 = vld [vmem:[#allocation2 + $0x40] sm:$0xff] }
  0xe2   : > { %v484_v6 = vadd.f32 %v475_v5, %v464_v2 }
  0xe3   : > { %v587_v7 = vld [vmem:[#allocation2 + $0x38] sm:$0xff] }
  0xe4   : > { %493 = vst.msk [vmem:[#allocation2 + $0x40] sm:$0xff] %vm258_vm2, %v484_v6  ;;  %v596_v8 = vadd.f32 %v587_v7, %v574_v3 }
  0xe5   : > { %v613_v9 = vld [vmem:[#allocation2 + $0x30] sm:$0xff] }
  0xe6   : > { %v626_v10 = vadd.f32 %v906_v4, %v613_v9  ;;  %605 = vst.msk [vmem:[#allocation2 + $0x38] sm:$0xff] %vm258_vm2, %v596_v8 }
  0xe8   : > { %635 = vst.msk [vmem:[%s913_s14 + $0x30] sm:$0xff] %vm258_vm2, %v626_v10 }
  0xeb   : > { %v588_v12 = vld [vmem:[#allocation2 + $0x40] sm:$0xff] }
  0xec   : > { %v597_v13 = vadd.f32 %v588_v12, %v577_v11 }
  0xed   : > { %v614_v14 = vld [vmem:[#allocation2 + $0x38] sm:$0xff] }
  0xee   : > { %v627_v15 = vadd.f32 %v906_v4, %v614_v14  ;;  %606 = vst.msk [vmem:[#allocation2 + $0x40] sm:$0xff] %vm258_vm2, %v597_v13 }
  0xf0   : > { %636 = vst.msk [vmem:[%s913_s14 + $0x38] sm:$0xff] %vm258_vm2, %v627_v15 }
  0xf5   : > { %v615_v16 = vld [vmem:[#allocation2 + $0x40] sm:$0xff] }
  0xf6   : > { %v628_v17 = vadd.f32 %v906_v4, %v615_v16 }
  0xf8   : > { %637 = vst.msk [vmem:[%s913_s14 + $0x40] sm:$0xff] %vm258_vm2, %v628_v17 }
  0xf9 PF: > { %s13_s12 = sadd.s32 1, %s765_s12  }
  0xfa   : > { %p10_p4 = scmp.ge.s32.totalorder %s13_s12, 4  }
  0xfc   :  { %12 = sbr.rel (!%p10_p4) target bundleno = 1 (0x1), region = 65 }

</bundles_post_ra>
